<compile_context>
chip_gen: v7x
topology: tpu7x:2x2x1
jax: 0.10.0
libtpu: 0.0.40
codegen_flags: <defaults>
</compile_context>

<pallas_src>
import functools

import jax
import jax.numpy as jnp
from jax.experimental import pallas as pl
from jax.experimental.pallas import tpu as pltpu


def _attention_kernel(x_ref, wt_ref, b_ref, u_ref, o_ref, *, valid_seq):
    # x_ref : (Bblk, Seq_p, H)  block of batch elements (bf16 or f32)
    # wt_ref: (H, A)            W_omega transposed (done once in the wrapper)
    # b_ref : (1, A)  f32
    # u_ref : (1, A)  f32
    # o_ref : (Bblk, H)
    Bblk, Seq, H = x_ref.shape
    A = wt_ref.shape[1]

    # --- One long MXU matmul over the whole block: (Bblk*Seq, H) @ (H, A) ---
    # Seq_p is a multiple of the sublane pack (16 for bf16, 8 for f32), so the
    # reshape is layout-compatible (no relayout copy).
    x_flat = x_ref[...].reshape(Bblk * Seq, H)
    v = jnp.tanh(
        jnp.dot(x_flat, wt_ref[...], preferred_element_type=jnp.float32)
        + b_ref[...]
    ).reshape(Bblk, Seq, A)                             # f32

    # --- Lane-dense scores: (Bblk, Seq) ---
    u = u_ref[...].reshape(1, 1, A)
    scores = jnp.sum(v * u, axis=-1)                    # (Bblk, Seq) f32

    # Mask padded sequence positions (wrapper pads Seq up to the sublane pack).
    if valid_seq < Seq:
        pos = jax.lax.broadcasted_iota(jnp.int32, (Bblk, Seq), 1)
        scores = jnp.where(pos < valid_seq, scores, -1e30)

    # --- Softmax over Seq (last axis) ---
    m = jnp.max(scores, axis=-1, keepdims=True)         # (Bblk, 1)
    e = jnp.exp(scores - m)                             # (Bblk, Seq)
    denom = jnp.sum(e, axis=-1, keepdims=True)          # (Bblk, 1)
    # Approx reciprocal (EUP slot, essentially free) only on the reduced-
    # precision transfer path; exact on f32 so the tight reference check holds.
    approx = x_ref.dtype != jnp.float32
    alphas = e * pl.reciprocal(denom, approx=approx)    # (Bblk, Seq) f32

    # --- Chunked VPU weighted sum over Seq ---
    # Accumulates into a (Bblk, H) f32 accumulator chunk-by-chunk instead of
    # materializing an x-block-sized (Bblk, Seq, H) temporary.
    CH = 16 if Seq % 16 == 0 else 8
    acc = jnp.zeros((Bblk, H), jnp.float32)
    for c in range(Seq // CH):                          # static trip count
        xs = x_ref[:, c * CH:(c + 1) * CH, :].astype(jnp.float32)  # (Bblk,CH,H)
        a = alphas[:, c * CH:(c + 1) * CH]                         # (Bblk,CH)
        acc = acc + jnp.sum(a[:, :, None] * xs, axis=1)
    o_ref[...] = acc.astype(o_ref.dtype)


@functools.partial(
    jax.jit,
    static_argnames=("block_b", "seq_pad", "valid_seq", "vmem_limit",
                     "transfer_dtype"))
def _attention_impl(x, w_omega, b_omega, u_omega, *, block_b, seq_pad,
                    valid_seq, vmem_limit, transfer_dtype):
    B, Seq, H = x.shape
    A = w_omega.shape[0]
    it = jnp.dtype(transfer_dtype).itemsize

    Bp = pl.cdiv(B, block_b) * block_b
    xp = x
    if Bp != B or seq_pad != Seq:
        # Zero batch rows give a valid (uniform over valid positions) softmax
        # and a zero output; zero seq positions are masked in-kernel.
        xp = jnp.pad(x, ((0, Bp - B), (0, seq_pad - Seq), (0, 0)))
    xp = xp.astype(transfer_dtype)
    wt = jnp.transpose(w_omega).astype(transfer_dtype)   # (H, A), done once
    b2 = b_omega.reshape(1, A).astype(jnp.float32)
    u2 = u_omega.reshape(1, A).astype(jnp.float32)

    cost = pl.CostEstimate(
        flops=2 * Bp * seq_pad * A * H + 2 * Bp * seq_pad * A
              + 2 * Bp * seq_pad * H,
        transcendentals=Bp * seq_pad * A + Bp * seq_pad,
        bytes_accessed=Bp * seq_pad * H * it + Bp * H * x.dtype.itemsize
                       + H * A * it + 4 * A * 4,
    )

    kernel = functools.partial(_attention_kernel, valid_seq=valid_seq)

    out = pl.pallas_call(
        kernel,
        out_shape=jax.ShapeDtypeStruct((Bp, H), x.dtype),
        grid_spec=pltpu.PrefetchScalarGridSpec(
            num_scalar_prefetch=0,
            grid=(Bp // block_b,),
            in_specs=[
                pl.BlockSpec((block_b, seq_pad, H), lambda b: (b, 0, 0)),  # x
                pl.BlockSpec((H, A), lambda b: (0, 0)),                    # W^T
                pl.BlockSpec((1, A), lambda b: (0, 0)),                    # b
                pl.BlockSpec((1, A), lambda b: (0, 0)),                    # u
            ],
            out_specs=pl.BlockSpec((block_b, H), lambda b: (b, 0)),
        ),
        compiler_params=pltpu.CompilerParams(
            dimension_semantics=("parallel",),          # megacore sharding
            vmem_limit_bytes=vmem_limit,
        ),
        cost_estimate=cost,
    )(xp, wt, b2, u2)

    return out[:B]


def attention_forward(x, w_omega, b_omega, u_omega, *, block_b=None,
                      transfer_dtype=jnp.bfloat16):
    """x: (B, Seq, H); W_omega: (A, H); b_omega: (A,); u_omega: (A,).

    Returns (B, H).  (The PyTorch module's trailing `.squeeze()` would return
    (H,) for B == 1; callers can squeeze — shape-only divergence.)
    """
    B, Seq, H = x.shape
    A = w_omega.shape[0]
    it = jnp.dtype(transfer_dtype).itemsize

    # ---- static planning (shapes only) ----
    seq_align = 16 if it == 2 else 8            # sublane pack of transfer dtype
    seq_pad = pl.cdiv(Seq, seq_align) * seq_align
    CH = seq_align

    # Generation-aware VMEM budget (v5e/v6e: 128 MiB, v7x: 64 MiB per TC).
    try:
        vmem_cap = int(pltpu.get_tpu_info().vmem_capacity_bytes)
    except Exception:  # not on TPU / info unavailable: assume the tightest gen
        vmem_cap = 64 * 1024 * 1024
    vmem_limit = int(vmem_cap * 0.8)            # headroom for Mosaic scratch
    budget = int(vmem_cap * 0.6)                # planning budget < limit

    # Per-batch-element VMEM bytes per grid step (generous: includes headroom
    # for the materialized x value feeding the MXU and the matmul/tanh outputs).
    per_b = (3 * seq_pad * H * it               # 2 pipeline buffers + value
             + 2 * seq_pad * A * 4              # matmul output + v
             + 6 * seq_pad * 4                  # scores / exp / alphas
             + 2 * CH * H * 4                   # chunked weighted-sum temps
             + 6 * H * 4)                       # accumulator + out tile (x2)
    fixed = 2 * (H * A * it + 2 * A * 4)        # weights + bias/u (x2 buffers)
    cap_b = max(1, (budget - fixed) // per_b)
    # Beyond ~16 MiB per x tile there is no DMA-efficiency gain, only VMEM /
    # spill pressure.
    cap_b = min(cap_b, max(1, (16 * 1024 * 1024) // (seq_pad * H * it)))

    align = 8
    if block_b is None:
        min_grid = 4                            # pipelining + v7x megacore
        b_aligned = pl.cdiv(B, align) * align
        desired = max(align, (pl.cdiv(b_aligned, min_grid) // align) * align)
        block_b = max(align, min((cap_b // align) * align, desired))
    else:
        block_b = max(align, (int(block_b) // align) * align)

    return _attention_impl(
        x, w_omega, b_omega, u_omega,
        block_b=int(block_b), seq_pad=int(seq_pad), valid_seq=int(Seq),
        vmem_limit=int(vmem_limit), transfer_dtype=transfer_dtype)


def attention_reference(x, w_omega, b_omega, u_omega):
    """Pure-JAX reference mirroring the PyTorch forward."""
    v = jnp.tanh(jnp.einsum("bsh,ah->bsa", x, w_omega) + b_omega)   # (B,Seq,A)
    vu = jnp.einsum("bsa,a->bs", v, u_omega)                        # (B,Seq)
    alphas = jax.nn.softmax(vu, axis=1)                             # (B,Seq)
    return jnp.einsum("bs,bsh->bh", alphas, x)                      # (B,H)


if __name__ == "__main__":
    B, Seq, H = 2, 8, 32      # batch, doc seq len, hidden size
    A = 16                    # attention_size

    key = jax.random.PRNGKey(0)
    kx, kw, kb, ku = jax.random.split(key, 4)

    x = jax.random.normal(kx, (B, Seq, H), dtype=jnp.float32)
    # deterministic synthetic params (PyTorch init: normal_(std=0.1))
    w_omega = 0.1 * jax.random.normal(kw, (A, H), dtype=jnp.float32)
    b_omega = 0.1 * jax.random.normal(kb, (A,), dtype=jnp.float32)
    u_omega = 0.1 * jax.random.normal(ku, (A,), dtype=jnp.float32)

    ref = attention_reference(x, w_omega, b_omega, u_omega)

    # 1) f32-transfer path: bit-tight against the reference.
    out_f32 = attention_forward(x, w_omega, b_omega, u_omega,
                                transfer_dtype=jnp.float32)
    jax.block_until_ready(out_f32)
    assert out_f32.shape == (B, H)
    assert jnp.allclose(out_f32, ref, atol=1e-5, rtol=1e-5), "f32 path mismatch"

    # 2) Default bf16-transfer path: looser tolerance (input-cast only; the
    #    MXU accumulation and softmax stay f32).
    out = attention_forward(x, w_omega, b_omega, u_omega)
    jax.block_until_ready(out)
    assert out.shape == (B, H)
    assert jnp.allclose(out, ref, atol=5e-2, rtol=5e-2), "bf16 path mismatch"

    # 3) Multi-step grid + non-multiple-of-8 Seq (exercises pipelining,
    #    batch blocking, and the in-kernel seq mask).
    B2, Seq2 = 40, 12
    x2 = jax.random.normal(kx, (B2, Seq2, H), dtype=jnp.float32)
    ref2 = attention_reference(x2, w_omega, b_omega, u_omega)
    out2 = attention_forward(x2, w_omega, b_omega, u_omega, block_b=8)
    jax.block_until_ready(out2)
    assert out2.shape == (B2, H)
    assert jnp.allclose(out2, ref2, atol=5e-2, rtol=5e-2), "blocked path mismatch"

    print("KERNEL_OK")
</pallas_src>

<mosaic_0001>
module attributes {stable_mosaic.version = 11 : i64} {
  func.func @_attention_kernel(%arg0: i32, %arg1: memref<8x8x32xf32, #tpu.memory_space<vmem>>, %arg2: memref<32x16xf32, #tpu.memory_space<vmem>>, %arg3: memref<1x16xf32, #tpu.memory_space<vmem>>, %arg4: memref<1x16xf32, #tpu.memory_space<vmem>>, %arg5: memref<8x32xf32, #tpu.memory_space<vmem>>) attributes {dimension_semantics = [#tpu.dimension_semantics<parallel>], iteration_bounds = array<i64: 1>, scalar_prefetch = 0 : i64, scratch_operands = 0 : i64, tpu.core_type = #tpu.core_type<tc>, window_params = [{transform_indices = @transform_0, window_bounds = array<i64: 8, 8, 32>}, {pipeline_mode = #tpu.pipeline_mode<synchronous>, transform_indices = @transform_1, window_bounds = array<i64: 32, 16>}, {pipeline_mode = #tpu.pipeline_mode<synchronous>, transform_indices = @transform_2, window_bounds = array<i64: 1, 16>}, {pipeline_mode = #tpu.pipeline_mode<synchronous>, transform_indices = @transform_3, window_bounds = array<i64: 1, 16>}, {transform_indices = @transform_4, window_bounds = array<i64: 8, 32>}]} {
    %c0 = arith.constant 0 : index
    %c0_0 = arith.constant 0 : index
    %c0_1 = arith.constant 0 : index
    %0 = vector.load %arg1[%c0, %c0_0, %c0_1] : memref<8x8x32xf32, #tpu.memory_space<vmem>>, vector<8x8x32xf32>
    %1 = vector.shape_cast %0 : vector<8x8x32xf32> to vector<64x32xf32>
    %c0_2 = arith.constant 0 : index
    %c0_3 = arith.constant 0 : index
    %2 = vector.load %arg2[%c0_2, %c0_3] : memref<32x16xf32, #tpu.memory_space<vmem>>, vector<32x16xf32>
    %cst = arith.constant dense<0.000000e+00> : vector<64x16xf32>
    %3 = tpu.matmul %1, %2, %cst {dimension_numbers = #tpu.dot_dimension_numbers<[1], [0], [0], [1], [0, 0, 1, 1], [], []>} : vector<64x32xf32>, vector<32x16xf32>, vector<64x16xf32> -> vector<64x16xf32>
    %c0_4 = arith.constant 0 : index
    %c0_5 = arith.constant 0 : index
    %4 = vector.load %arg3[%c0_4, %c0_5] : memref<1x16xf32, #tpu.memory_space<vmem>>, vector<1x16xf32>
    %5 = vector.broadcast %4 : vector<1x16xf32> to vector<64x16xf32>
    %6 = arith.addf %3, %5 : vector<64x16xf32>
    %7 = math.tanh %6 : vector<64x16xf32>
    %8 = vector.shape_cast %7 : vector<64x16xf32> to vector<8x8x16xf32>
    %c0_6 = arith.constant 0 : index
    %c0_7 = arith.constant 0 : index
    %9 = vector.load %arg4[%c0_6, %c0_7] : memref<1x16xf32, #tpu.memory_space<vmem>>, vector<1x16xf32>
    %10 = vector.shape_cast %9 : vector<1x16xf32> to vector<1x1x16xf32>
    %11 = vector.broadcast %10 : vector<1x1x16xf32> to vector<8x8x16xf32>
    %12 = arith.mulf %8, %11 : vector<8x8x16xf32>
    %cst_8 = arith.constant dense<0.000000e+00> : vector<8x8xf32>
    %13 = vector.multi_reduction <add>, %12, %cst_8 [2] : vector<8x8x16xf32> to vector<8x8xf32>
    %cst_9 = arith.constant dense<0xFF800000> : vector<8xf32>
    %14 = vector.multi_reduction <maximumf>, %13, %cst_9 [1] : vector<8x8xf32> to vector<8xf32>
    %15 = vector.shape_cast %14 : vector<8xf32> to vector<8x1xf32>
    %16 = vector.broadcast %15 : vector<8x1xf32> to vector<8x8xf32>
    %17 = arith.subf %13, %16 : vector<8x8xf32>
    %18 = math.exp %17 : vector<8x8xf32>
    %cst_10 = arith.constant dense<0.000000e+00> : vector<8xf32>
    %19 = vector.multi_reduction <add>, %18, %cst_10 [1] : vector<8x8xf32> to vector<8xf32>
    %20 = vector.shape_cast %19 : vector<8xf32> to vector<8x1xf32>
    %21 = tpu.reciprocal %20 : vector<8x1xf32> -> vector<8x1xf32>
    %22 = vector.broadcast %21 : vector<8x1xf32> to vector<8x8xf32>
    %23 = arith.mulf %18, %22 : vector<8x8xf32>
    %cst_11 = arith.constant 0.000000e+00 : f32
    %24 = vector.broadcast %cst_11 : f32 to vector<8x32xf32>
    %c0_12 = arith.constant 0 : index
    %c0_13 = arith.constant 0 : index
    %c0_14 = arith.constant 0 : index
    %25 = vector.load %arg1[%c0_12, %c0_13, %c0_14] : memref<8x8x32xf32, #tpu.memory_space<vmem>>, vector<8x8x32xf32>
    %26 = vector.shape_cast %23 : vector<8x8xf32> to vector<8x8x1xf32>
    %27 = vector.broadcast %26 : vector<8x8x1xf32> to vector<8x8x32xf32>
    %28 = arith.mulf %27, %25 : vector<8x8x32xf32>
    %cst_15 = arith.constant dense<0.000000e+00> : vector<8x32xf32>
    %29 = vector.multi_reduction <add>, %28, %cst_15 [1] : vector<8x8x32xf32> to vector<8x32xf32>
    %30 = arith.addf %24, %29 : vector<8x32xf32>
    %c0_16 = arith.constant 0 : index
    %c0_17 = arith.constant 0 : index
    %31 = vector.load %arg5[%c0_16, %c0_17] : memref<8x32xf32, #tpu.memory_space<vmem>>, vector<8x32xf32>
    tpu.vector_store %arg5[%c0_16, %c0_17], %30 {strides = array<i32>} : memref<8x32xf32, #tpu.memory_space<vmem>>, vector<8x32xf32>,
    return
  }
  func.func @transform_0(%arg0: i32) -> (i32, i32, i32) {
    %c0_i32 = arith.constant 0 : i32
    %c0_i32_0 = arith.constant 0 : i32
    %c0_i32_1 = arith.constant 0 : i32
    return %arg0, %c0_i32, %c0_i32_0 : i32, i32, i32
  }
  func.func @transform_1(%arg0: i32) -> (i32, i32) {
    %c0_i32 = arith.constant 0 : i32
    %c0_i32_0 = arith.constant 0 : i32
    %c0_i32_1 = arith.constant 0 : i32
    return %c0_i32, %c0_i32_0 : i32, i32
  }
  func.func @transform_2(%arg0: i32) -> (i32, i32) {
    %c0_i32 = arith.constant 0 : i32
    %c0_i32_0 = arith.constant 0 : i32
    %c0_i32_1 = arith.constant 0 : i32
    return %c0_i32, %c0_i32_0 : i32, i32
  }
  func.func @transform_3(%arg0: i32) -> (i32, i32) {
    %c0_i32 = arith.constant 0 : i32
    %c0_i32_0 = arith.constant 0 : i32
    %c0_i32_1 = arith.constant 0 : i32
    return %c0_i32, %c0_i32_0 : i32, i32
  }
  func.func @transform_4(%arg0: i32) -> (i32, i32) {
    %c0_i32 = arith.constant 0 : i32
    %c0_i32_0 = arith.constant 0 : i32
    return %arg0, %c0_i32 : i32, i32
  }
}

</mosaic_0001>

<bundles_post_ra>
// kernel: _attention_impl.1
= control target key start
LH: loop header
LB: loop body
LE: loop exit
PB: predicated region body
PF: predicated region fallthrough
CT: control target
= control target key end

     0   :  { %vm36_vm0 = vcmask 261120   ;;  %vm189_vm1 = vcmask 130048   ;;  %v222_v56 = vlaneseq  ;;  %vm256_vm2 = vcmask 1041409   ;;  %s901_s1 = inlined_call_operand.vmem [shape: f32[32,16], index: 1, kind: input, shape index: {}]   ;;  %s902_s0 = inlined_call_operand.vmem [shape: f32[8,8,32], index: 0, kind: input, shape index: {}]   ;;  %s903_s2 = inlined_call_operand.vmem [shape: f32[1,16], index: 2, kind: input, shape index: {}]   ;;  %s904_s3 = inlined_call_operand.vmem [shape: f32[1,16], index: 3, kind: input, shape index: {}]   ;;  %s905_s4 = inlined_call_operand.vmem [shape: f32[8,32], index: 4, kind: output, shape index: {}]  }
   0x1   :  { %v25_v0 = vld [vmem:[%s901_s1] sm:$0xff]  ;;  %v26_v1 = vld [vmem:[%s901_s1 + $0x8] sm:$0xff]  ;;  %v27_v2 = vld [vmem:[%s901_s1 + $0x10] sm:$0xff]  ;;  %vm258_vm3 = vcmask 1042434   ;;  %vm260_vm4 = vcmask 1043459   ;;  %vm262_vm5 = vcmask 1044484  }
   0x2   :  { %v640_v3 = vpack.c.bf16 %v26_v1, %v25_v0  ;;  %v28_v4 = vld [vmem:[%s901_s1 + $0x18] sm:$0xff]  ;;  %v730_v5 = vld [vmem:[%s902_s0] sm:$0xff]  ;;  %v744_v8 = vld [vmem:[%s902_s0 + $0x8] sm:$0xff]  ;;  %v223_v57 = vand.u32 127, %v222_v56  ;;  %v797_v58 = vshrl.u32 %v222_v56, 7  ;;  %vm264_vm6 = vcmask 1045509  }
   0x3   :  { %v644_v6 = vpack.c.bf16 %v28_v4, %v27_v2  ;;  %628 = vmatprep.mubr.msk.f32.mxu0 %vm36_vm0, %v730_v5  ;;  %v737_v7 = vld [vmem:[%s902_s0 + $0x20] sm:$0xff]  ;;  %v749_v9 = vld [vmem:[%s902_s0 + $0x28] sm:$0xff]  ;;  %v754_v10 = vld [vmem:[%s902_s0 + $0x10] sm:$0xff]  ;;  %vm266_vm7 = vcmask 1046534   ;;  %vm268_vm8 = vcmask 1047559   ;;  %vm271_vm9 = vcmask 64512  }
   0x4   :  { %641 = vmatprep.subr.bf16.mxu0 %v640_v3  ;;  %648 = vmatprep.subr.bf16.mxu1 %v640_v3  ;;  %v759_v11 = vld [vmem:[%s902_s0 + $0x30] sm:$0xff]  ;;  %v770_v12 = vld [vmem:[%s902_s0 + $0x18] sm:$0xff]  ;;  %v598_v14 = vld [vmem:[%s903_s2] ss:$0 sm:$0xff]  ;;  %v800_v60 = vsub.s32 %v223_v57, %v797_v58 }
   0x5   :  { %643 = vmatpush3.bf16.msra.mxu0 %v640_v3  ;;  %650 = vmatpush3.bf16.msra.mxu1 %v640_v3  ;;  %v777_v13 = vld [vmem:[%s902_s0 + $0x38] sm:$0xff]  ;;  %v607_v31 = vld [vmem:[%s904_s3] ss:$0 sm:$0xff] }
   0x6   :  { %645 = vmatprep.subr.bf16.mxu0 %v644_v6  ;;  %649 = vmatprep.subr.bf16.mxu1 %v644_v6 }
   0x7   :  { %634 = vmatprep.mubr.msk.f32.mxu1 %vm36_vm0, %v737_v7 }
   0x9   :  { %647 = vmatpush3.bf16.msra.mxu0 %v644_v6  ;;  %651 = vmatpush3.bf16.msra.mxu1 %v644_v6 }
   0xc   :  { %629 = vmatmul.mubr.msk.f32.vlgmr.msra.gmra.mrb[0].mxu0 %vm36_vm0, %v744_v8  ;;  %635 = vmatmul.mubr.msk.f32.vlgmr.msra.gmra.mrb[0].mxu1 %vm36_vm0, %v749_v9 }
   0xd   :  { %631 = vmatprep.mubr.msk.f32.mxu0 %vm36_vm0, %v754_v10  ;;  %637 = vmatprep.mubr.msk.f32.mxu1 %vm36_vm0, %v759_v11 }
  0x10   :  { %632 = vmatmul.mubr.msk.f32.gmra.mrb[2].mxu0 %vm36_vm0, %v770_v12  ;;  %638 = vmatmul.mubr.msk.f32.gmra.mrb[2].mxu1 %vm36_vm0, %v777_v13 }
  0xdf   :  { %v630_v15 = vpop.f32.mrb[0].mxu0  ;;  %v636_v16 = vpop.f32.mrb[0].mxu1 }
  0xe0   :  { %v133_v17 = vadd.f32 %v630_v15, %v598_v14  ;;  %v127_v18 = vpop.f32.mrb[1].mxu0  ;;  %v147_v19 = vpop.f32.mrb[1].mxu1  ;;  %v153_v29 = vadd.f32 %v636_v16, %v598_v14 }
  0xe1   :  { %v128_v20 = vadd.f32 %v598_v14, %v127_v18  ;;  %v148_v21 = vadd.f32 %v598_v14, %v147_v19 }
  0xe2   :  { %655 = vtanh.f32 %v133_v17 }
  0xe3   :  { %657 = vtanh.f32 %v128_v20  ;;  %v633_v22 = vpop.f32.mrb[2].mxu0  ;;  %v639_v23 = vpop.f32.mrb[2].mxu1 }
  0xe4   :  { %v143_v24 = vadd.f32 %v633_v22, %v598_v14  ;;  %v137_v25 = vpop.f32.mrb[3].mxu0  ;;  %v157_v26 = vpop.f32.mrb[3].mxu1  ;;  %659 = vtanh.f32 %v148_v21  ;;  %v163_v30 = vadd.f32 %v639_v23, %v598_v14 }
  0xe5   :  { %v138_v27 = vadd.f32 %v598_v14, %v137_v25  ;;  %v158_v28 = vadd.f32 %v598_v14, %v157_v26 }
  0xe6   :  { %661 = vtanh.f32 %v143_v24 }
  0xe7   :  { %663 = vtanh.f32 %v138_v27 }
  0xe8   :  { %665 = vtanh.f32 %v158_v28  ;;  %v689_v28 = vmov 0  }
  0xe9   :  { %667 = vtanh.f32 %v153_v29  ;;  %654 = vset.pattern.permute.xlu0 %v689_v28  ;;  %653 = vset.pattern.permute.xlu1 %v689_v28  ;;  %v278_v29 = vsub.s32 0, %v797_v58 }
  0xea   :  { %669 = vtanh.f32 %v163_v30  ;;  %v282_v30 = vsub.s32 1, %v797_v58 }
  0xec   :  { %v656_v32 = vpop.eup %655 }
  0xed   :  { %v658_v33 = vpop.eup %657  ;;  %v182_v34 = vmul.f32 %v656_v32, %v607_v31  ;;  %v290_v32 = vsub.s32 3, %v797_v58 }
  0xee   :  { %v660_v35 = vpop.eup %659  ;;  %v181_v37 = vmul.f32 %v658_v33, %v607_v31 }
  0xef   :  { %v193_v36 = vsel %vm189_vm1, %v182_v34, 0.0  ;;  %v185_v41 = vmul.f32 %v660_v35, %v607_v31 }
  0xf0   :  { %v662_v38 = vpop.eup %661  ;;  %194 = vadd.xlane.f32.xlu0 %v193_v36  ;;  %v190_v44 = vsel %vm189_vm1, %v181_v37, 0.0  ;;  %v294_v37 = vsub.s32 4, %v797_v58 }
  0xf1   :  { %v664_v39 = vpop.eup %663  ;;  %v184_v40 = vmul.f32 %v662_v38, %v607_v31  ;;  %v202_v47 = vsel %vm189_vm1, %v185_v41, 0.0 }
  0xf2   :  { %v666_v42 = vpop.eup %665  ;;  %v183_v45 = vmul.f32 %v664_v39, %v607_v31 }
  0xf3   :  { %v199_v43 = vsel %vm189_vm1, %v184_v40, 0.0  ;;  %v668_v46 = vpop.eup %667  ;;  %v187_v48 = vmul.f32 %v666_v42, %v607_v31 }
  0xf4   :  { %200 = vadd.xlane.f32.xlu1 %v199_v43  ;;  %191 = vadd.xlane.f32.xlu0 %v190_v44  ;;  %v196_v49 = vsel %vm189_vm1, %v183_v45, 0.0  ;;  %v186_v50 = vmul.f32 %v668_v46, %v607_v31  ;;  %v670_v51 = vpop.eup %669  ;;  %v298_v44 = vsub.s32 5, %v797_v58 }
  0xf5   :  { %v208_v52 = vsel %vm189_vm1, %v187_v48, 0.0  ;;  %v188_v54 = vmul.f32 %v670_v51, %v607_v31  ;;  %v286_v31 = vsub.s32 2, %v797_v58  ;;  %v302_v48 = vsub.s32 6, %v797_v58 }
  0xf6   :  { %v205_v53 = vsel %vm189_vm1, %v186_v50, 0.0 }
  0xf7   :  { %v211_v55 = vsel %vm189_vm1, %v188_v54, 0.0 }
  0xf8   :  { %197 = vadd.xlane.f32.xlu1 %v196_v49  ;;  %203 = vadd.xlane.f32.xlu0 %v202_v47 }
  0xfc   :  { %206 = vadd.xlane.f32.xlu1 %v205_v53  ;;  %209 = vadd.xlane.f32.xlu0 %v208_v52  ;;  %v306_v52 = vsub.s32 7, %v797_v58 }
 0x100   :  { %212 = vadd.xlane.f32.xlu1 %v211_v55 }
 0x17d   :  { %v195_v59 = vpop.xlane.xlu0 %194 }
 0x17e   :  { %v231_v0 = vrot.slane %v195_v59, %v800_v60 }
 0x181   :  { %v201_v61 = vpop.xlane.xlu1 %200  ;;  %v192_v62 = vpop.xlane.xlu0 %191 }
 0x182   :  { %v227_v63 = vrot.slane %v192_v62, %v800_v60  ;;  %v239_v6 = vrot.slane %v201_v61, %v800_v60 }
 0x184   :  { %v257_v14 = vsel %vm256_vm2, %v231_v0, %v227_v63 }
 0x185   :  { %v198_v1 = vpop.xlane.xlu1 %197  ;;  %v204_v2 = vpop.xlane.xlu0 %203 }
 0x186   :  { %v235_v3 = vrot.slane %v198_v1, %v800_v60  ;;  %v243_v4 = vrot.slane %v204_v2, %v800_v60 }
 0x188   :  { %v259_v15 = vsel %vm258_vm3, %v235_v3, %v257_v14 }
 0x189   :  { %v261_v16 = vsel %vm260_vm4, %v239_v6, %v259_v15  ;;  %v207_v17 = vpop.xlane.xlu1 %206  ;;  %v210_v18 = vpop.xlane.xlu0 %209 }
 0x18a   :  { %v263_v19 = vsel %vm262_vm5, %v243_v4, %v261_v16  ;;  %v247_v20 = vrot.slane %v207_v17, %v800_v60  ;;  %v251_v21 = vrot.slane %v210_v18, %v800_v60 }
 0x18c   :  { %v265_v22 = vsel %vm264_vm6, %v247_v20, %v263_v19 }
 0x18d   :  { %v213_v23 = vpop.xlane.xlu1 %212  ;;  %v267_v25 = vsel %vm266_vm7, %v251_v21, %v265_v22 }
 0x18e   :  { %v255_v24 = vrot.slane %v213_v23, %v800_v60 }
 0x190   :  { %v269_v26 = vsel %vm268_vm8, %v255_v24, %v267_v25 }
 0x191   :  { %v272_v27 = vsel %vm271_vm9, %v269_v26, -inf }
 0x192   :  { %273 = vmax.xlane.f32.xlu0 %v272_v27 }
 0x21f   :  { %v274_v33 = vpop.xlane.xlu0 %273 }
 0x220   :  { %v279_v34 = vrot.slane %v274_v33, %v278_v29  ;;  %v283_v35 = vrot.slane %v274_v33, %v282_v30  ;;  %v287_v36 = vrot.slane %v274_v33, %v286_v31  ;;  %v291_v38 = vrot.slane %v274_v33, %v290_v32 }
 0x221   :  { %v295_v45 = vrot.slane %v274_v33, %v294_v37  ;;  %v299_v49 = vrot.slane %v274_v33, %v298_v44  ;;  %v303_v53 = vrot.slane %v274_v33, %v302_v48 }
 0x222   :  { %v316_v39 = vsub.f32 %v192_v62, %v279_v34  ;;  %v317_v40 = vsub.f32 %v195_v59, %v283_v35  ;;  %v318_v41 = vsub.f32 %v198_v1, %v287_v36  ;;  %v319_v46 = vsub.f32 %v201_v61, %v291_v38 }
 0x223   :  { %v320_v50 = vsub.f32 %v204_v2, %v295_v45  ;;  %v321_v54 = vsub.f32 %v207_v17, %v299_v49  ;;  %v307_v59 = vrot.slane %v274_v33, %v306_v52  ;;  %v322_v61 = vsub.f32 %v210_v18, %v303_v53 }
 0x224   :  { %v324_v42 = vmul.f32 1.442695, %v316_v39  ;;  %v326_v43 = vmul.f32 1.442695, %v317_v40  ;;  %v328_v47 = vmul.f32 1.442695, %v318_v41 }
 0x225   :  { %v330_v51 = vmul.f32 1.442695, %v319_v46  ;;  %v332_v55 = vmul.f32 1.442695, %v320_v50  ;;  %v334_v62 = vmul.f32 1.442695, %v321_v54  ;;  %v323_v0 = vsub.f32 %v213_v23, %v307_v59 }
 0x226   :  { %671 = vpow2.f32 %v324_v42  ;;  %v336_v1 = vmul.f32 1.442695, %v322_v61 }
 0x227   :  { %673 = vpow2.f32 %v326_v43  ;;  %v338_v3 = vmul.f32 1.442695, %v323_v0 }
 0x228   :  { %675 = vpow2.f32 %v328_v47 }
 0x229   :  { %677 = vpow2.f32 %v330_v51 }
 0x22a   :  { %679 = vpow2.f32 %v332_v55 }
 0x22b   :  { %681 = vpow2.f32 %v334_v62 }
 0x22c   :  { %683 = vpow2.f32 %v336_v1 }
 0x22d   :  { %685 = vpow2.f32 %v338_v3 }
 0x230   :  { %v672_v56 = vpop.eup %671 }
 0x231   :  { %v674_v57 = vpop.eup %673  ;;  %349 = vperm.xlu1 %653, %v672_v56  }
 0x232   :  { %352 = vperm.xlu0 %654, %v674_v57   ;;  %v676_v63 = vpop.eup %675 }
 0x233   :  { %v678_v2 = vpop.eup %677 }
 0x234   :  { %v680_v4 = vpop.eup %679 }
 0x235   :  { %355 = vperm.xlu1 %653, %v676_v63   ;;  %v682_v6 = vpop.eup %681 }
 0x236   :  { %v684_v14 = vpop.eup %683 }
 0x237   :  { %v686_v15 = vpop.eup %685 }
 0x239   :  { %358 = vperm.xlu1 %653, %v678_v2  }
 0x23d   :  { %361 = vperm.xlu1 %653, %v680_v4  }
 0x241   :  { %364 = vperm.xlu1 %653, %v682_v6  }
 0x245   :  { %367 = vperm.xlu1 %653, %v684_v14  }
 0x249   :  { %370 = vperm.xlu1 %653, %v686_v15  }
 0x2b0   :  { %v350_v16 = vpop.permute.xlu1 %349 }
 0x2b1   :  { %v353_v20 = vpop.permute.xlu0 %352  ;;  %v375_v23 = vrot.slane %v350_v16, %v800_v60 }
 0x2b2   :  { %v379_v22 = vrot.slane %v353_v20, %v800_v60 }
 0x2b4   :  { %v356_v17 = vpop.permute.xlu1 %355  ;;  %v404_v28 = vsel %vm256_vm2, %v379_v22, %v375_v23 }
 0x2b5   :  { %v383_v24 = vrot.slane %v356_v17, %v800_v60 }
 0x2b7   :  { %v405_v34 = vsel %vm258_vm3, %v383_v24, %v404_v28 }
 0x2b8   :  { %v359_v18 = vpop.permute.xlu1 %358 }
 0x2b9   :  { %v387_v25 = vrot.slane %v359_v18, %v800_v60 }
 0x2bb   :  { %v406_v36 = vsel %vm260_vm4, %v387_v25, %v405_v34 }
 0x2bc   :  { %v362_v19 = vpop.permute.xlu1 %361 }
 0x2bd   :  { %v391_v26 = vrot.slane %v362_v19, %v800_v60 }
 0x2bf   :  { %v407_v38 = vsel %vm262_vm5, %v391_v26, %v406_v36 }
 0x2c0   :  { %v365_v21 = vpop.permute.xlu1 %364 }
 0x2c1   :  { %v395_v33 = vrot.slane %v365_v21, %v800_v60 }
 0x2c3   :  { %v408_v40 = vsel %vm264_vm6, %v395_v33, %v407_v38 }
 0x2c4   :  { %v368_v27 = vpop.permute.xlu1 %367 }
 0x2c5   :  { %v399_v35 = vrot.slane %v368_v27, %v800_v60 }
 0x2c7   :  { %v409_v42 = vsel %vm266_vm7, %v399_v35, %v408_v40 }
 0x2c8   :  { %v371_v39 = vpop.permute.xlu1 %370 }
 0x2c9   :  { %v403_v41 = vrot.slane %v371_v39, %v800_v60 }
 0x2cb   :  { %v410_v43 = vsel %vm268_vm8, %v403_v41, %v409_v42 }
 0x2cc   :  { %v412_v45 = vsel %vm271_vm9, %v410_v43, 0.0 }
 0x2cd   :  { %413 = vadd.xlane.f32.xlu1 %v412_v45 }
 0x35a   :  { %v414_v46 = vpop.xlane.xlu1 %413 }
 0x35b   :  { %687 = vrcp.f32 %v414_v46 }
 0x365   :  { %v688_v47 = vpop.eup %687 }
 0x366   :  { %v420_v49 = vrot.slane %v688_v47, %v278_v29  ;;  %v424_v51 = vrot.slane %v688_v47, %v282_v30  ;;  %v428_v60 = vrot.slane %v688_v47, %v286_v31  ;;  %v432_v55 = vrot.slane %v688_v47, %v290_v32 }
 0x367   :  { %v436_v61 = vrot.slane %v688_v47, %v294_v37  ;;  %v440_v30 = vrot.slane %v688_v47, %v298_v44  ;;  %v444_v31 = vrot.slane %v688_v47, %v302_v48  ;;  %v448_v32 = vrot.slane %v688_v47, %v306_v52 }
 0x368   :  { %v457_v50 = vmul.f32 %v672_v56, %v420_v49  ;;  %v458_v53 = vmul.f32 %v674_v57, %v424_v51  ;;  %v459_v54 = vmul.f32 %v676_v63, %v428_v60  ;;  %v460_v59 = vmul.f32 %v678_v2, %v432_v55 }
 0x369   :  { %v461_v29 = vmul.f32 %v680_v4, %v436_v61  ;;  %v462_v56 = vmul.f32 %v682_v6, %v440_v30  ;;  %v463_v57 = vmul.f32 %v684_v14, %v444_v31  ;;  %v464_v62 = vmul.f32 %v686_v15, %v448_v32 }
 0x36a   :  { %467 = vperm.xlu0 %654, %v457_v50  }
 0x36e   :  { %472 = vperm.xlu0 %654, %v458_v53  }
 0x372   :  { %477 = vperm.xlu0 %654, %v459_v54  }
 0x376   :  { %482 = vperm.xlu0 %654, %v460_v59  }
 0x37a   :  { %487 = vperm.xlu0 %654, %v461_v29  }
 0x37e   :  { %492 = vperm.xlu0 %654, %v462_v56  }
 0x382   :  { %497 = vperm.xlu0 %654, %v463_v57  }
 0x386   :  { %502 = vperm.xlu0 %654, %v464_v62  }
 0x3e9   :  { %v468_v63 = vpop.permute.xlu0 %467 }
 0x3ea   :  { %v505_v44 = vmul.f32 %v468_v63, %v730_v5 }
 0x3ec   :  { %v513_v58 = vsel %vm36_vm0, %v505_v44, 0.0 }
 0x3ed   :  { %v473_v37 = vpop.permute.xlu0 %472  ;;  %v514_v16 = vrot.slane %v513_v58, 4 }
 0x3ee   :  { %v506_v0 = vmul.f32 %v473_v37, %v744_v8 }
 0x3ef   :  { %v515_v20 = vadd.f32 %v514_v16, %v513_v58 }
 0x3f0   :  { %v520_v3 = vsel %vm36_vm0, %v506_v0, 0.0 }
 0x3f1   :  { %v478_v1 = vpop.permute.xlu0 %477  ;;  %v521_v6 = vrot.slane %v520_v3, 4  ;;  %v516_v28 = vrot.slane %v515_v20, 2 }
 0x3f2   :  { %v507_v2 = vmul.f32 %v478_v1, %v754_v10 }
 0x3f3   :  { %v522_v18 = vadd.f32 %v521_v6, %v520_v3  ;;  %v517_v42 = vadd.f32 %v516_v28, %v515_v20 }
 0x3f4   :  { %v527_v48 = vsel %vm36_vm0, %v507_v2, 0.0 }
 0x3f5   :  { %v483_v4 = vpop.permute.xlu0 %482  ;;  %v528_v14 = vrot.slane %v527_v48, 4 }
 0x3f6   :  { %v508_v52 = vmul.f32 %v483_v4, %v770_v12  ;;  %v523_v12 = vrot.slane %v522_v18, 2 }
 0x3f7   :  { %v529_v10 = vadd.f32 %v528_v14, %v527_v48 }
 0x3f8   :  { %v534_v15 = vsel %vm36_vm0, %v508_v52, 0.0  ;;  %v524_v38 = vadd.f32 %v523_v12, %v522_v18 }
 0x3f9   :  { %v535_v8 = vrot.slane %v534_v15, 4  ;;  %v488_v17 = vpop.permute.xlu0 %487  ;;  %v530_v26 = vrot.slane %v529_v10, 2 }
 0x3fa   :  { %v509_v5 = vmul.f32 %v488_v17, %v737_v7  ;;  %v525_v50 = vrot.slane %v524_v38, 1 }
 0x3fb   :  { %v536_v21 = vadd.f32 %v535_v8, %v534_v15  ;;  %v531_v40 = vadd.f32 %v530_v26, %v529_v10 }
 0x3fc   :  { %v541_v19 = vsel %vm36_vm0, %v509_v5, 0.0  ;;  %v526_v30 = vadd.f32 %v525_v50, %v524_v38 }
 0x3fd   :  { %v542_v22 = vrot.slane %v541_v19, 4  ;;  %v493_v23 = vpop.permute.xlu0 %492  ;;  %v537_v33 = vrot.slane %v536_v21, 2  ;;  %v532_v60 = vrot.slane %v531_v40, 1 }
 0x3fe   :  { %v510_v24 = vmul.f32 %v493_v23, %v749_v9 }
 0x3ff   :  { %v543_v25 = vadd.f32 %v542_v22, %v541_v19  ;;  %v538_v43 = vadd.f32 %v537_v33, %v536_v21  ;;  %v533_v32 = vadd.f32 %v532_v60, %v531_v40 }
 0x400   :  { %v548_v27 = vsel %vm36_vm0, %v510_v24, 0.0 }
 0x401   :  { %v549_v34 = vrot.slane %v548_v27, 4  ;;  %v498_v35 = vpop.permute.xlu0 %497  ;;  %v544_v7 = vrot.slane %v543_v25, 2  ;;  %v539_v55 = vrot.slane %v538_v43, 1 }
 0x402   :  { %v511_v36 = vmul.f32 %v498_v35, %v759_v11  ;;  %v518_v11 = vrot.slane %v517_v42, 1 }
 0x403   :  { %v550_v39 = vadd.f32 %v549_v34, %v548_v27  ;;  %v545_v47 = vadd.f32 %v544_v7, %v543_v25  ;;  %v540_v63 = vadd.f32 %v539_v55, %v538_v43 }
 0x404   :  { %v555_v41 = vsel %vm36_vm0, %v511_v36, 0.0  ;;  %v519_v62 = vadd.f32 %v518_v11, %v517_v42 }
 0x405   :  { %v551_v9 = vrot.slane %v550_v39, 2  ;;  %v556_v45 = vrot.slane %v555_v41, 4  ;;  %v503_v46 = vpop.permute.xlu0 %502  ;;  %v546_v29 = vrot.slane %v545_v47, 1 }
 0x406   :  { %v512_v49 = vmul.f32 %v503_v46, %v777_v13  ;;  %v585_v1 = vsel %vm256_vm2, %v526_v30, %v519_v62 }
 0x407   :  { %v552_v51 = vadd.f32 %v551_v9, %v550_v39  ;;  %v557_v53 = vadd.f32 %v556_v45, %v555_v41  ;;  %v547_v0 = vadd.f32 %v546_v29, %v545_v47  ;;  %v586_v3 = vsel %vm258_vm3, %v533_v32, %v585_v1 }
 0x408   :  { %v562_v54 = vsel %vm36_vm0, %v512_v49, 0.0  ;;  %v587_v4 = vsel %vm260_vm4, %v540_v63, %v586_v3 }
 0x409   :  { %v558_v59 = vrot.slane %v557_v53, 2  ;;  %v563_v61 = vrot.slane %v562_v54, 4  ;;  %v553_v56 = vrot.slane %v552_v51, 1  ;;  %v588_v52 = vsel %vm262_vm5, %v547_v0, %v587_v4 }
 0x40b   :  { %v559_v31 = vadd.f32 %v558_v59, %v557_v53  ;;  %v564_v57 = vadd.f32 %v563_v61, %v562_v54  ;;  %v554_v44 = vadd.f32 %v553_v56, %v552_v51 }
 0x40d   :  { %v560_v37 = vrot.slane %v559_v31, 1  ;;  %v565_v13 = vrot.slane %v564_v57, 2  ;;  %v589_v6 = vsel %vm264_vm6, %v554_v44, %v588_v52 }
 0x40f   :  { %v566_v2 = vadd.f32 %v565_v13, %v564_v57  ;;  %v561_v48 = vadd.f32 %v560_v37, %v559_v31 }
 0x411   :  { %v567_v58 = vrot.slane %v566_v2, 1  ;;  %v590_v15 = vsel %vm266_vm7, %v561_v48, %v589_v6 }
 0x413   :  { %v568_v14 = vadd.f32 %v567_v58, %v566_v2 }
 0x415   :  { %v591_v16 = vsel %vm268_vm8, %v568_v14, %v590_v15 }
 0x416   :  { %593 = vst.msk [vmem:[%s905_s4] sm:$0xff] %vm36_vm0, %v591_v16 }

</bundles_post_ra>
